<compile_context>
chip_gen: v7x
topology: tpu7x:2x2x1
jax: 0.10.0
libtpu: 0.0.40
codegen_flags: <defaults>
</compile_context>

<pallas_src>
import functools

import jax
import jax.numpy as jnp
from jax.experimental import pallas as pl
from jax.experimental.pallas import tpu as pltpu


def _round_up(x, m):
    return ((x + m - 1) // m) * m


def _linear_kernel(x_ref, w_ref, b_ref, o_ref):
    # Canonical [tm, D] x [D, C_pad] MXU matmul, f32 accumulation.
    acc = jnp.dot(x_ref[...], w_ref[...], preferred_element_type=jnp.float32)
    o_ref[...] = (acc + b_ref[...].astype(jnp.float32)).astype(o_ref.dtype)


# Cap the scoped VMEM request so it is safe on v7x (64 MiB/TC) as well as
# v5e/v6e (128 MiB).
_VMEM_CAP_BYTES = 48 * 1024 * 1024


@functools.partial(jax.jit, static_argnames=("block_b", "use_bf16"))
def classification_head(x, weight, bias, *, block_b=1024, use_bf16=False):
    """y = x @ weight.T + bias  (exact nn.Linear forward semantics).

    x:      [B, D]
    weight: [C, D]   (PyTorch nn.Linear convention)
    bias:   [C]
    returns [B, C]
    """
    B, D = x.shape
    C, D2 = weight.shape
    assert D == D2 and bias.shape == (C,)

    out_dtype = x.dtype

    # Optionally stream x / W as bf16 (MXU-native, halves HBM traffic on the
    # dominant x stream); accumulation stays f32 inside the kernel.
    if use_bf16:
        x = x.astype(jnp.bfloat16)
        weight = weight.astype(jnp.bfloat16)

    # Lane-dense output: pad classes to a multiple of 128 lanes (unmasked vst).
    C_pad = _round_up(C, 128)

    # One-time layout fix in XLA: weight as [D, C_pad] so the kernel does a
    # plain (1,),(0,) contraction with no transpose on the weight path.
    w_t = jnp.pad(weight.T, ((0, 0), (0, C_pad - C)))          # [D, C_pad]
    b_p = jnp.pad(bias, (0, C_pad - C)).reshape(1, C_pad)       # [1, C_pad]

    # --- batch tile sizing ---------------------------------------------------
    # Sublane-aligned; at least 2 tiles when B is big enough so the "parallel"
    # batch axis can land on both TensorCores of a v7x chip.
    tm = max(8, min(_round_up(block_b, 8), _round_up(pl.cdiv(B, 2), 8)))
    tm = min(tm, _round_up(B, 8))

    x_bytes = jnp.dtype(x.dtype).itemsize
    w_bytes = jnp.dtype(w_t.dtype).itemsize
    o_bytes = jnp.dtype(out_dtype).itemsize

    def _vmem_needed(t):
        # Every BlockSpec operand is double-buffered, including the
        # grid-resident weight and bias.
        return 2 * (t * D * x_bytes            # x tile
                    + D * C_pad * w_bytes      # resident weight
                    + C_pad * 4                # bias
                    + t * C_pad * o_bytes)     # output tile

    # Shrink the batch tile if the double-buffered working set would not fit
    # the (v7x-safe) VMEM cap.
    while _vmem_needed(tm) > _VMEM_CAP_BYTES and tm > 8:
        tm = max(8, _round_up(tm // 2, 8))
    # TODO(synk): if 2*D*C_pad*w_bytes alone exceeds the cap (very large D or
    # num_classes), tile the class axis (second grid dim) or add a D-reduction
    # grid axis with an f32 accumulator instead of shrinking tm further.

    vmem_limit = int(min(_VMEM_CAP_BYTES,
                         max(_vmem_needed(tm) + (2 << 20), 16 << 20)))

    grid_b = pl.cdiv(B, tm)

    cost = pl.CostEstimate(
        flops=2 * B * D * C_pad,
        transcendentals=0,
        bytes_accessed=(B * D * x_bytes
                        + D * C_pad * w_bytes
                        + C_pad * 4
                        + B * C_pad * o_bytes),
    )

    out = pl.pallas_call(
        _linear_kernel,
        out_shape=jax.ShapeDtypeStruct((B, C_pad), out_dtype),
        grid_spec=pltpu.PrefetchScalarGridSpec(
            num_scalar_prefetch=0,
            grid=(grid_b,),
            in_specs=[
                pl.BlockSpec((tm, D), lambda i: (i, 0)),       # stream x over B
                pl.BlockSpec((D, C_pad), lambda i: (0, 0)),    # W resident in VMEM
                pl.BlockSpec((1, C_pad), lambda i: (0, 0)),    # bias resident
            ],
            out_specs=pl.BlockSpec((tm, C_pad), lambda i: (i, 0)),
        ),
        compiler_params=pltpu.CompilerParams(
            dimension_semantics=("parallel",),   # shard B tiles across TCs (v7x)
            vmem_limit_bytes=vmem_limit,
        ),
        cost_estimate=cost,
    )(x, w_t, b_p)

    return out[:, :C]


if __name__ == "__main__":
    # Small shapes consistent with the module: input_dim=32, num_classes=8, batch=4.
    input_dim, num_classes, batch = 32, 8, 4

    key = jax.random.PRNGKey(0)
    kx, kw, kb = jax.random.split(key, 3)

    # Deterministic parameter init mimicking nn.Linear (uniform in +/- 1/sqrt(fan_in)).
    bound = 1.0 / (input_dim ** 0.5)
    weight = jax.random.uniform(kw, (num_classes, input_dim), jnp.float32,
                                minval=-bound, maxval=bound)
    bias = jax.random.uniform(kb, (num_classes,), jnp.float32,
                              minval=-bound, maxval=bound)
    x = jax.random.normal(kx, (batch, input_dim), jnp.float32)

    y = classification_head(x, weight, bias)
    jax.block_until_ready(y)

    # Correctness check against plain-JAX reference of the PyTorch forward.
    y_ref = x @ weight.T + bias
    assert y.shape == (batch, num_classes)
    assert jnp.allclose(y, y_ref, atol=1e-5, rtol=1e-5)

    print("KERNEL_OK")
</pallas_src>

<mosaic_0001>
module attributes {stable_mosaic.version = 11 : i64} {
  func.func @_linear_kernel(%arg0: i32, %arg1: memref<8x32xf32, #tpu.memory_space<vmem>>, %arg2: memref<32x128xf32, #tpu.memory_space<vmem>>, %arg3: memref<1x128xf32, #tpu.memory_space<vmem>>, %arg4: memref<8x128xf32, #tpu.memory_space<vmem>>) attributes {dimension_semantics = [#tpu.dimension_semantics<parallel>], iteration_bounds = array<i64: 1>, scalar_prefetch = 0 : i64, scratch_operands = 0 : i64, tpu.core_type = #tpu.core_type<tc>, window_params = [{transform_indices = @transform_0, window_bounds = array<i64: 8, 32>}, {pipeline_mode = #tpu.pipeline_mode<synchronous>, transform_indices = @transform_1, window_bounds = array<i64: 32, 128>}, {pipeline_mode = #tpu.pipeline_mode<synchronous>, transform_indices = @transform_2, window_bounds = array<i64: 1, 128>}, {transform_indices = @transform_3, window_bounds = array<i64: 8, 128>}]} {
    %c0 = arith.constant 0 : index
    %c0_0 = arith.constant 0 : index
    %0 = vector.load %arg1[%c0, %c0_0] : memref<8x32xf32, #tpu.memory_space<vmem>>, vector<8x32xf32>
    %c0_1 = arith.constant 0 : index
    %c0_2 = arith.constant 0 : index
    %1 = vector.load %arg2[%c0_1, %c0_2] : memref<32x128xf32, #tpu.memory_space<vmem>>, vector<32x128xf32>
    %cst = arith.constant dense<0.000000e+00> : vector<8x128xf32>
    %2 = tpu.matmul %0, %1, %cst {dimension_numbers = #tpu.dot_dimension_numbers<[1], [0], [0], [1], [0, 0, 1, 1], [], []>} : vector<8x32xf32>, vector<32x128xf32>, vector<8x128xf32> -> vector<8x128xf32>
    %c0_3 = arith.constant 0 : index
    %c0_4 = arith.constant 0 : index
    %3 = vector.load %arg3[%c0_3, %c0_4] : memref<1x128xf32, #tpu.memory_space<vmem>>, vector<1x128xf32>
    %4 = vector.broadcast %3 : vector<1x128xf32> to vector<8x128xf32>
    %5 = arith.addf %2, %4 : vector<8x128xf32>
    %c0_5 = arith.constant 0 : index
    %c0_6 = arith.constant 0 : index
    %6 = vector.load %arg4[%c0_5, %c0_6] : memref<8x128xf32, #tpu.memory_space<vmem>>, vector<8x128xf32>
    tpu.vector_store %arg4[%c0_5, %c0_6], %5 {strides = array<i32>} : memref<8x128xf32, #tpu.memory_space<vmem>>, vector<8x128xf32>,
    return
  }
  func.func @transform_0(%arg0: i32) -> (i32, i32) {
    %c0_i32 = arith.constant 0 : i32
    %c0_i32_0 = arith.constant 0 : i32
    return %arg0, %c0_i32 : i32, i32
  }
  func.func @transform_1(%arg0: i32) -> (i32, i32) {
    %c0_i32 = arith.constant 0 : i32
    %c0_i32_0 = arith.constant 0 : i32
    %c0_i32_1 = arith.constant 0 : i32
    return %c0_i32, %c0_i32_0 : i32, i32
  }
  func.func @transform_2(%arg0: i32) -> (i32, i32) {
    %c0_i32 = arith.constant 0 : i32
    %c0_i32_0 = arith.constant 0 : i32
    %c0_i32_1 = arith.constant 0 : i32
    return %c0_i32, %c0_i32_0 : i32, i32
  }
  func.func @transform_3(%arg0: i32) -> (i32, i32) {
    %c0_i32 = arith.constant 0 : i32
    %c0_i32_0 = arith.constant 0 : i32
    return %arg0, %c0_i32 : i32, i32
  }
}

</mosaic_0001>

<bundles_post_ra>
// kernel: classification_head.1
= control target key start
LH: loop header
LB: loop body
LE: loop exit
PB: predicated region body
PF: predicated region fallthrough
CT: control target
= control target key end

     0   :  { %8 = vsyncpa [#allocation3], 0  ;;  %v172_v2 = vmov 0.0|0.0   ;;  %vm173_vm0 = vmmov 0   ;;  %v174_v6 = vmov 0.0   ;;  %vm27_vm1 = vcmask 261120   ;;  %s228_s0 = inlined_call_operand.vmem [shape: f32[4,32], index: 0, kind: input, shape index: {}]   ;;  %s229_s1 = inlined_call_operand.vmem [shape: f32[32,128], index: 1, kind: input, shape index: {}]   ;;  %s230_s2 = inlined_call_operand.vmem [shape: f32[1,128], index: 2, kind: input, shape index: {}]   ;;  %s231_s3 = inlined_call_operand.hbm [shape: f32[4,128], index: 3, kind: output, shape index: {}]  }
   0x1   :  { %v16_v0 = vld [vmem:[%s229_s1] sm:$0xff]  ;;  %v17_v1 = vld [vmem:[%s229_s1 + $0x8] sm:$0xff]  ;;  %136 = vmatprep.subr.bf16.mxu0 %v172_v2  ;;  %v18_v4 = vld [vmem:[%s229_s1 + $0x10] sm:$0xff]  ;;  %133 = vmatprep.mubr.msk.f32.mxu0 %vm173_vm0, %v174_v6 }
   0x2   :  { %v137_v3 = vpack.c.bf16 %v17_v1, %v16_v0  ;;  %v19_v5 = vld [vmem:[%s229_s1 + $0x18] sm:$0xff]  ;;  %v15_v8 = vld [vmem:[%s228_s0] sm:$0xff] }
   0x3   :  { %v140_v7 = vpack.c.bf16 %v19_v5, %v18_v4  ;;  %v118_v9 = vld [vmem:[%s230_s2] ss:$0 sm:$0xff] }
   0x4   :  { %138 = vmatpush3.bf16.msra.mxu0 %v137_v3 }
   0x5   :  { %139 = vmatprep.subr.bf16.mxu0 %v172_v2 }
   0x8   :  { %141 = vmatpush3.bf16.msra.mxu0 %v140_v7 }
   0xb   :  { %134 = vmatmul.mubr.msk.f32.vlgmr.msra.gmra.mrb[0].mxu0 %vm27_vm1, %v15_v8 }
  0xde   :  { %v97_v10 = vpop.f32.mrb[0].mxu0 }
  0xdf   :  { %v98_v11 = vadd.f32 %v118_v9, %v97_v10  ;;  %v135_v12 = vpop.f32.mrb[1].mxu0 }
  0xe1   :  { %101 = vst [vmem:[#allocation2] sm:$0xff] %v98_v11 }
  0xe2   :  { %106 = vsyncadd [#allocation3], 64  ;;  %s175_s1 = smov [#allocation2]  }
  0xe3   :  { %s107_s24 = sshll.u32 %s175_s1, 4  ;;  %s108_s24 = int_to_ptr.vmem [resolvable:$true] %s107_s24 }
  0xe4   :  { %s148_s25 = scalar_lea.vmem %s108_s24, 64  ;;  %s152_s26 = scalar_lea.vmem %s108_s24, 128 }
  0xe5   :  { %p149_p0 = scmp.ne.s32.totalorder %s108_s24, %s148_s25  ;;  %p153_p1 = scmp.lt.s32.totalorder %s108_s24, %s108_s24 }
  0xe6   :  { %p154_p2 = scmp.lt.s32.totalorder %s152_s26, %s148_s25 }
  0xe8   :  { %p155_p3 = por %p154_p2, %p153_p1 }
  0xea   :  { %p156_p4 = pnand %p155_p3, %p149_p0 }
  0xec   :  { %159 = shalt.err (!%p156_p4)
}
  0xed   :  { %s160_s2 = scalar_lea.hbm %s231_s3, 64 }
  0xee   :  { %p161_p5 = scmp.ne.s32.totalorder %s231_s3, %s160_s2  ;;  %p164_p6 = scmp.lt.u32.totalorder %s160_s2, %s231_s3 }
  0xf0   :  { %p166_p7 = pnand %p164_p6, %p161_p5 }
  0xf2   :  { %169 = shalt.err (!%p166_p7)
}
  0xf3   :  { %s176_s5 = smov 64   ;;  %s177_s6 = smov 4  }
  0xf4   :  { %113 = dma.vmem_to_hbm [thread:$0]  %s108_s24, 64, %s231_s3, [#allocation3], %s176_s5, %s176_s5, %s177_s6  }
  0xf5   :  { %170 = dma.done.wait [#allocation3], 128  }
  0xf6   :  { %171 = vsyncadd [#allocation3], 4294967168 }
  0xf7   :  { %117 = vsyncpa [#allocation3], 1 }

</bundles_post_ra>
